<compile_context>
chip_gen: v5e
topology: v5e:2x2
jax: 0.10.0
libtpu: 0.0.40
codegen_flags: <defaults>
</compile_context>

<pallas_src>
import functools

import jax
import jax.numpy as jnp
from jax import lax
from jax.experimental import pallas as pl
from jax.experimental.pallas import tpu as pltpu


# --------------------------- Pallas kernel ---------------------------------

def _pyconv_kernel(xw_ref, w_ref, o_ref, *, k, tl):
    # xw_ref: (1, 1, C_in, TL + K - 1)  bf16 input window for this (n, L-tile)
    # w_ref : (C_out, C_in * K)         bf16, grid-invariant -> VMEM resident
    # o_ref : (1, C_out, TL)            f32, lane-dense (TL % 128 == 0)
    # im2col: 9 statically shifted (C_in, TL) slices stacked on the sublane
    # axis; row index = t * C_in + c (matches the flattened weight layout).
    cols = [xw_ref[0, 0, :, pl.ds(t, tl)] for t in range(k)]
    col = jnp.concatenate(cols, axis=0)                      # (C_in*K, TL)
    acc = jnp.dot(w_ref[...], col, preferred_element_type=jnp.float32)
    o_ref[0, :, :] = acc.astype(o_ref.dtype)


def pyconv4_pallas(x, dense_w, *, compute_dtype=jnp.bfloat16):
    """x: (N, C_in, L) f32; dense_w: (C_out, C_in, 9) f32 (group/tap folded)."""
    N, C_in, L = x.shape
    C_out, _, K = dense_w.shape
    halo = K // 2                                            # 4

    # Lane-dense tiling of the length axis (multiple of 128, capped at 512).
    tl = min(512, ((L + 127) // 128) * 128)
    n_lt = -(-L // tl)
    Lpad = n_lt * tl

    xc = x.astype(compute_dtype)
    xp = jnp.pad(xc, ((0, 0), (0, 0), (halo, Lpad - L + halo)))
    # Overlapping (TL + K - 1)-wide windows, one per L tile -> every in-kernel
    # tap shift is a static slice (no dynamic lane offsets).
    xw = jnp.stack(
        [xp[:, :, j * tl: j * tl + tl + 2 * halo] for j in range(n_lt)],
        axis=1,
    )  # (N, n_lt, C_in, TL + K - 1)

    # (C_out, C_in, K) -> (C_out, K*C_in), column index = t*C_in + c.
    w2 = jnp.transpose(dense_w, (0, 2, 1)).reshape(C_out, K * C_in)
    w2 = w2.astype(compute_dtype)

    kern = functools.partial(_pyconv_kernel, k=K, tl=tl)

    itemsize = jnp.dtype(compute_dtype).itemsize
    flops = 2 * N * C_out * C_in * K * Lpad
    bytes_accessed = (xw.size + w2.size) * itemsize + N * C_out * Lpad * 4

    out = pl.pallas_call(
        kern,
        out_shape=jax.ShapeDtypeStruct((N, C_out, Lpad), jnp.float32),
        grid=(N, n_lt),
        in_specs=[
            pl.BlockSpec((1, 1, C_in, tl + 2 * halo), lambda n, j: (n, j, 0, 0)),
            pl.BlockSpec((C_out, K * C_in), lambda n, j: (0, 0)),
        ],
        out_specs=pl.BlockSpec((1, C_out, tl), lambda n, j: (n, 0, j)),
        compiler_params=pltpu.CompilerParams(
            dimension_semantics=("parallel", "parallel")),
        cost_estimate=pl.CostEstimate(
            flops=flops, transcendentals=0, bytes_accessed=bytes_accessed),
    )(xw, w2)
    return out[:, :, :L]


# ----------------- parameter construction (plain-JAX glue) -----------------

def make_branch_weight(key, c_out, c_in, groups, k):
    """Deterministic Conv1d weight, PyTorch shape (C_out, C_in/groups, K)."""
    fan_in = (c_in // groups) * k
    bound = 1.0 / (fan_in ** 0.5)
    return jax.random.uniform(
        key, (c_out, c_in // groups, k), jnp.float32, minval=-bound, maxval=bound
    )


def expand_grouped(w, c_in, groups):
    """Expand grouped weight (C_out, C_in/groups, K) -> dense (C_out, C_in, K)."""
    c_out, c_in_g, k = w.shape
    c_out_g = c_out // groups
    dense = jnp.zeros((c_out, c_in, k), w.dtype)
    for g in range(groups):
        dense = dense.at[
            g * c_out_g:(g + 1) * c_out_g, g * c_in_g:(g + 1) * c_in_g, :
        ].set(w[g * c_out_g:(g + 1) * c_out_g])
    return dense


def pad_taps(dense, k_max):
    """Center k-tap kernel inside k_max taps (preserves padding=k//2 semantics)."""
    k = dense.shape[2]
    off = (k_max - k) // 2
    return jnp.pad(dense, ((0, 0), (0, 0), (off, k_max - k - off)))


def build_pyconv4_weight(key, inplans, planes, kernels=(3, 5, 7, 9),
                         groups=(1, 4, 8, 16)):
    c_out_branch = planes // 4
    keys = jax.random.split(key, 4)
    dense_parts, raw = [], []
    for kk, g, sub in zip(kernels, groups, keys):
        w = make_branch_weight(sub, c_out_branch, inplans, g, kk)
        raw.append((w, g, kk))
        dense_parts.append(pad_taps(expand_grouped(w, inplans, g), max(kernels)))
    return jnp.concatenate(dense_parts, axis=0), raw


def reference_pyconv4(x, raw):
    """Pure-JAX reference using grouped conv (PyTorch PyConv4 semantics)."""
    outs = []
    for w, g, kk in raw:
        o = lax.conv_general_dilated(
            x, w, window_strides=(1,), padding=[(kk // 2, kk // 2)],
            dimension_numbers=("NCH", "OIH", "NCH"), feature_group_count=g)
        outs.append(o)
    return jnp.concatenate(outs, axis=1)


if __name__ == "__main__":
    # Small shapes consistent with the module: groups up to 16 require
    # inplans % 16 == 0 and (planes // 4) % 16 == 0.
    N, inplans, planes, L = 2, 32, 64, 16

    key = jax.random.PRNGKey(0)
    kx, kw = jax.random.split(key)
    x = jax.random.normal(kx, (N, inplans, L), jnp.float32)

    dense_w, raw = build_pyconv4_weight(kw, inplans, planes)

    out = pyconv4_pallas(x, dense_w)
    out = jax.block_until_ready(out)

    # Reference on the same bf16-rounded operands (kernel uses bf16 inputs with
    # f32 accumulation), PyConv4 module has bias=False.
    x_r = x.astype(jnp.bfloat16).astype(jnp.float32)
    raw_r = [(w.astype(jnp.bfloat16).astype(jnp.float32), g, kk)
             for (w, g, kk) in raw]
    ref = reference_pyconv4(x_r, raw_r)

    assert out.shape == (N, planes, L)
    err = float(jnp.max(jnp.abs(out - ref)))
    assert jnp.allclose(out, ref, atol=2e-2, rtol=2e-2), err

    print("KERNEL_OK")
</pallas_src>

<mosaic_0001>
module attributes {stable_mosaic.version = 11 : i64} {
  func.func @_pyconv_kernel(%arg0: i32, %arg1: i32, %arg2: memref<1x1x32x136xbf16, #tpu.memory_space<vmem>>, %arg3: memref<64x288xbf16, #tpu.memory_space<vmem>>, %arg4: memref<1x64x128xf32, #tpu.memory_space<vmem>>) attributes {dimension_semantics = [#tpu.dimension_semantics<parallel>, #tpu.dimension_semantics<parallel>], iteration_bounds = array<i64: 2, 1>, scalar_prefetch = 0 : i64, scratch_operands = 0 : i64, tpu.core_type = #tpu.core_type<tc>, window_params = [{transform_indices = @transform_0, window_bounds = array<i64: 1, 1, 32, 136>}, {pipeline_mode = #tpu.pipeline_mode<synchronous>, transform_indices = @transform_1, window_bounds = array<i64: 64, 288>}, {transform_indices = @transform_2, window_bounds = array<i64: 1, 64, 128>}]} {
    %c0 = arith.constant 0 : index
    %c0_0 = arith.constant 0 : index
    %c0_1 = arith.constant 0 : index
    %c0_2 = arith.constant 0 : index
    %0 = vector.load %arg2[%c0, %c0_0, %c0_1, %c0_2] : memref<1x1x32x136xbf16, #tpu.memory_space<vmem>>, vector<1x1x32x128xbf16>
    %1 = vector.shape_cast %0 : vector<1x1x32x128xbf16> to vector<32x128xbf16>
    %c0_3 = arith.constant 0 : index
    %c0_4 = arith.constant 0 : index
    %c0_5 = arith.constant 0 : index
    %c1 = arith.constant 1 : index
    %2 = vector.load %arg2[%c0_3, %c0_4, %c0_5, %c1] : memref<1x1x32x136xbf16, #tpu.memory_space<vmem>>, vector<1x1x32x128xbf16>
    %3 = vector.shape_cast %2 : vector<1x1x32x128xbf16> to vector<32x128xbf16>
    %c0_6 = arith.constant 0 : index
    %c0_7 = arith.constant 0 : index
    %c0_8 = arith.constant 0 : index
    %c2 = arith.constant 2 : index
    %4 = vector.load %arg2[%c0_6, %c0_7, %c0_8, %c2] : memref<1x1x32x136xbf16, #tpu.memory_space<vmem>>, vector<1x1x32x128xbf16>
    %5 = vector.shape_cast %4 : vector<1x1x32x128xbf16> to vector<32x128xbf16>
    %c0_9 = arith.constant 0 : index
    %c0_10 = arith.constant 0 : index
    %c0_11 = arith.constant 0 : index
    %c3 = arith.constant 3 : index
    %6 = vector.load %arg2[%c0_9, %c0_10, %c0_11, %c3] : memref<1x1x32x136xbf16, #tpu.memory_space<vmem>>, vector<1x1x32x128xbf16>
    %7 = vector.shape_cast %6 : vector<1x1x32x128xbf16> to vector<32x128xbf16>
    %c0_12 = arith.constant 0 : index
    %c0_13 = arith.constant 0 : index
    %c0_14 = arith.constant 0 : index
    %c4 = arith.constant 4 : index
    %8 = vector.load %arg2[%c0_12, %c0_13, %c0_14, %c4] : memref<1x1x32x136xbf16, #tpu.memory_space<vmem>>, vector<1x1x32x128xbf16>
    %9 = vector.shape_cast %8 : vector<1x1x32x128xbf16> to vector<32x128xbf16>
    %c0_15 = arith.constant 0 : index
    %c0_16 = arith.constant 0 : index
    %c0_17 = arith.constant 0 : index
    %c5 = arith.constant 5 : index
    %10 = vector.load %arg2[%c0_15, %c0_16, %c0_17, %c5] : memref<1x1x32x136xbf16, #tpu.memory_space<vmem>>, vector<1x1x32x128xbf16>
    %11 = vector.shape_cast %10 : vector<1x1x32x128xbf16> to vector<32x128xbf16>
    %c0_18 = arith.constant 0 : index
    %c0_19 = arith.constant 0 : index
    %c0_20 = arith.constant 0 : index
    %c6 = arith.constant 6 : index
    %12 = vector.load %arg2[%c0_18, %c0_19, %c0_20, %c6] : memref<1x1x32x136xbf16, #tpu.memory_space<vmem>>, vector<1x1x32x128xbf16>
    %13 = vector.shape_cast %12 : vector<1x1x32x128xbf16> to vector<32x128xbf16>
    %c0_21 = arith.constant 0 : index
    %c0_22 = arith.constant 0 : index
    %c0_23 = arith.constant 0 : index
    %c7 = arith.constant 7 : index
    %14 = vector.load %arg2[%c0_21, %c0_22, %c0_23, %c7] : memref<1x1x32x136xbf16, #tpu.memory_space<vmem>>, vector<1x1x32x128xbf16>
    %15 = vector.shape_cast %14 : vector<1x1x32x128xbf16> to vector<32x128xbf16>
    %c0_24 = arith.constant 0 : index
    %c0_25 = arith.constant 0 : index
    %c0_26 = arith.constant 0 : index
    %c8 = arith.constant 8 : index
    %16 = vector.load %arg2[%c0_24, %c0_25, %c0_26, %c8] : memref<1x1x32x136xbf16, #tpu.memory_space<vmem>>, vector<1x1x32x128xbf16>
    %17 = vector.shape_cast %16 : vector<1x1x32x128xbf16> to vector<32x128xbf16>
    %18 = tpu.concatenate %1, %3, %5, %7, %9, %11, %13, %15, %17 in 0 : vector<32x128xbf16>, vector<32x128xbf16>, vector<32x128xbf16>, vector<32x128xbf16>, vector<32x128xbf16>, vector<32x128xbf16>, vector<32x128xbf16>, vector<32x128xbf16>, vector<32x128xbf16> -> vector<288x128xbf16>
    %c0_27 = arith.constant 0 : index
    %c0_28 = arith.constant 0 : index
    %19 = vector.load %arg3[%c0_27, %c0_28] : memref<64x288xbf16, #tpu.memory_space<vmem>>, vector<64x288xbf16>
    %cst = arith.constant dense<0.000000e+00> : vector<64x128xf32>
    %20 = tpu.matmul %19, %18, %cst {dimension_numbers = #tpu.dot_dimension_numbers<[1], [0], [0], [1], [0, 0, 1, 1], [], []>} : vector<64x288xbf16>, vector<288x128xbf16>, vector<64x128xf32> -> vector<64x128xf32>
    %c0_29 = arith.constant 0 : index
    %c0_30 = arith.constant 0 : index
    %c0_31 = arith.constant 0 : index
    %21 = vector.load %arg4[%c0_29, %c0_30, %c0_31] : memref<1x64x128xf32, #tpu.memory_space<vmem>>, vector<1x64x128xf32>
    %22 = vector.shape_cast %21 : vector<1x64x128xf32> to vector<64x128xf32>
    %23 = vector.shape_cast %20 : vector<64x128xf32> to vector<1x64x128xf32>
    tpu.vector_store %arg4[%c0_29, %c0_30, %c0_31], %23 {strides = array<i32>} : memref<1x64x128xf32, #tpu.memory_space<vmem>>, vector<1x64x128xf32>,
    return
  }
  func.func @transform_0(%arg0: i32, %arg1: i32) -> (i32, i32, i32, i32) {
    %c0_i32 = arith.constant 0 : i32
    %c0_i32_0 = arith.constant 0 : i32
    %c0_i32_1 = arith.constant 0 : i32
    return %arg0, %arg1, %c0_i32, %c0_i32_0 : i32, i32, i32, i32
  }
  func.func @transform_1(%arg0: i32, %arg1: i32) -> (i32, i32) {
    %c0_i32 = arith.constant 0 : i32
    %c0_i32_0 = arith.constant 0 : i32
    %c0_i32_1 = arith.constant 0 : i32
    return %c0_i32, %c0_i32_0 : i32, i32
  }
  func.func @transform_2(%arg0: i32, %arg1: i32) -> (i32, i32, i32) {
    %c0_i32 = arith.constant 0 : i32
    %c0_i32_0 = arith.constant 0 : i32
    return %arg0, %c0_i32, %arg1 : i32, i32, i32
  }
}

</mosaic_0001>

<bundles_post_ra>
// kernel: tpu_custom_call.1
= control target key start
LH: loop header
LB: loop body
LE: loop exit
PB: predicated region body
PF: predicated region fallthrough
CT: control target
= control target key end

     0   :  { %7 = vsyncpa [#allocation3], 0  ;;  %s1228_s0 = inlined_call_operand.hbm [shape: bf16[2,1,32,136], index: 0, kind: input, shape index: {}]   ;;  %s1229_s1 = inlined_call_operand.hbm [shape: bf16[64,288], index: 1, kind: input, shape index: {}]   ;;  %s1230_s2 = inlined_call_operand.hbm [shape: f32[2,64,128], index: 2, kind: output, shape index: {}]  }
   0x1   :  { %9 = vsyncpa [#allocation3 + $0x1], 0 }
   0x2   :  { %10 = vsyncpa [#allocation6], 0 }
   0x3   :  { %11 = vsyncpa [#allocation4], 0 }
   0x4   :  { %13 = vsyncpa [#allocation4 + $0x1], 0  ;;  %s1031_s9 = smov 0   ;;  %s1033_s10 = smov 0  }
   0x5   :  { %s1035_s11 = smov 0   ;;  %s1037_s12 = smov 0  }
   0x6   :  { %s1039_s13 = smov 0   ;;  %s1041_s14 = smov 0  }
   0x7 LB: > { %s637_s15 = sadd.s32 4294967295, %s999_s14   ;;  %s638_s16 = sadd.s32 4294967294, %s999_s14   ;;  %s999_s14 = sphi %s1041_s14, %s19_s14   ;;  %s995_s13 = sphi %s1039_s13, %s1242_s13   ;;  %s991_s12 = sphi %s1037_s12, %s1241_s12   ;;  %s987_s11 = sphi %s1035_s11, %s1240_s11   ;;  %s983_s10 = sphi %s1033_s10, %s1239_s10   ;;  %s979_s9 = sphi %s1031_s9, %s1238_s9  }
   0x8   : > { %p53_p0 = scmp.ne.s32.totalorder %s983_s10, %s979_s9  ;;  %p1065_p1 = scmp.eq.s32.totalorder %s637_s15, 0 }
   0x9   : > { %p1069_p2 = scmp.eq.s32.totalorder %s637_s15, 1  ;;  %p106_p3 = scmp.eq.s32.totalorder %s638_s16, 1 }
   0xa   : > { %p1075_p4 = por %p1065_p1, %p53_p0  ;;  %p639_p5 = scmp.ge.s32.totalorder %s999_s14, 1 }
   0xb   : > { %p1080_p6 = por %p106_p3, %p53_p0  ;;  %p113_p7 = scmp.lt.s32.totalorder %s999_s14, 3 }
   0xc   : > { %s124_s23 = sshll.u32 %s1229_s1, 4  ;;  %s1001_s25 = smov [#allocation5]   ;;  %s125_s23 = int_to_ptr.hbm [resolvable:$true] %s124_s23 }
   0xd   : > { %p1088_p8 = pnand %p639_p5, %p113_p7  ;;  %s126_s26 = sshll.u32 %s1001_s25, 4  ;;  %s127_s26 = int_to_ptr.vmem [resolvable:$true] %s126_s26 }
   0xe   : > { %p641_p11 = scmp.ge.s32.totalorder %s999_s14, 2  ;;  %s1002_s27 = smov 192  }
   0xf   : > { %p774_p9 = pneg %p1088_p8  ;;  %s1003_s28 = smov 12  }
  0x10   : > { %s31_s29 = sadd.s32 1, %s995_s13  ;;  %s40_s30 = sadd.s32 1, %s987_s11 }
  0x11   : > { %p775_p10 = pnand %p774_p9, %p1065_p1  ;;  %p33_p12 = scmp.ge.s32.totalorder %s31_s29, 2 }
  0x12   : > { %p47_p13 = scmp.ne.s32.totalorder %s987_s11, %s983_s10  ;;  %p48_p0 = scmp.eq.s32.totalorder %s999_s14, 0 }
  0x13   : > { %777 = dma.hbm_to_vmem [thread:$0]  (!%p775_p10), %s125_s23, 1536, %s127_s26, [#allocation6], %s1002_s27, %s1002_s27, %s1003_s28  }
  0x14   : > { %s1244_s29 = smov (%p33_p12, %s31_s29), 0  ;;  %p1104_p3 = por %p48_p0, %p47_p13 }
  0x15   : > { %p1110_p5 = por %p1069_p2, %p47_p13  ;;  %s35_s5 = ssub.s32 %s995_s13, %s1244_s29 }
  0x16   : > { %p787_p7 = scmp.lt.s32.totalorder %s999_s14, 2  ;;  %p38_p9 = scmp.eq.s32.totalorder %s35_s5, 0 }
  0x17   : > { %s140_s6 = sand.u32 1, %s987_s11   ;;  %s730_s15 = sshll.u32 %s995_s13, 5 }
  0x18   : > { %s642_s7 = sshll.u32 %s140_s6, 5  ;;  %s151_s22 = scalar_lea.hbm %s1228_s0, %s730_s15 }
  0x19   : > { %s1119_s8 = scalar_select %p38_p9, %s987_s11, %s40_s30  }
  0x1a   : > { %s144_s23 = scalar_lea.vmem [#allocation2], %s642_s7  ;;  %s152_s18 = sshll.u32 %s151_s22, 4  ;;  %s153_s18 = int_to_ptr.hbm [resolvable:$true] %s152_s18 }
  0x1b   : > { %s154_s25 = sshll.u32 %s144_s23, 4  ;;  %p779_p2 = pnand %p787_p7, %p1104_p3  ;;  %s155_s25 = int_to_ptr.vmem [resolvable:$true] %s154_s25 }
  0x1c   : > { %s141_s26 = scalar_lea.sflag [#allocation3], %s140_s6  ;;  %s1004_s27 = smov 128  }
  0x1d   : > { %s1005_s28 = smov 8   ;;  %166 = sbr.rel (%p1088_p8) target bundleno = 414 (0x19e), region = 28 }
  0x1e   : > { %781 = dma.hbm_to_vmem [thread:$0]  (!%p779_p2), %s153_s18, 512, %s155_s25, %s141_s26, %s1004_s27, %s1004_s27, %s1005_s28  }
  0x1f   : > { %s1130_s30 = sand.u32 (!%p1088_p8), 1, %s983_s10  }
  0x20   : > { %s646_s5 = sshll.u32 (!%p1088_p8), %s1130_s30, 5  ;;  %s169_s7 = scalar_lea.sflag (!%p1088_p8), [#allocation3], %s1130_s30 }
  0x21   : > { %s1134_s15 = scalar_lea.vmem (!%p1088_p8), [#allocation2], %s646_s5 }
  0x22   : > { %966 = dma.done.wait (%p1075_p4), %s169_s7, 512  }
  0x23   : > { %968 = vsyncadd (%p1075_p4), %s169_s7, 4294966784 }
  0x24   : > { %970 = dma.done.wait (%p1065_p1), [#allocation6], 1536  }
  0x25   : > { %972 = vsyncadd (%p1065_p1), [#allocation6], 4294965760  ;;  %v667_v0 = vld [vmem:[%s1134_s15 + $0x10] sm:$0xf]  ;;  %v736_v1 = vld [vmem:[%s1134_s15 + $0x14] sm:$0xf0] }
  0x26   : > { %v659_v2 = vld [vmem:[%s1134_s15] sm:$0xf]  ;;  %v668_v3 = vor.u32 %v736_v1, %v667_v0  ;;  %v734_v4 = vld [vmem:[%s1134_s15 + $0x4] sm:$0xf0]  ;;  %s1006_s19 = smov 125   ;;  %s1007_s24 = smov 121  }
  0x27   : > { %v660_v5 = vor.u32 %v734_v4, %v659_v2  ;;  %v735_v6 = vld [vmem:[%s1134_s15 + $0x14] sm:$0xf]  ;;  %v669_v7 = vld [vmem:[%s1134_s15 + $0x18] sm:$0xf0]  ;;  %v733_v8 = vld [vmem:[%s1134_s15 + $0x4] sm:$0xf] }
  0x28   : > { %266 = vrot.lane.b32.xlu0 %v668_v3, %s1006_s19  ;;  %318 = vrot.lane.b32.xlu2 %v668_v3, %s1007_s24  ;;  %v661_v9 = vld [vmem:[%s1134_s15 + $0x8] sm:$0xf0]  ;;  %v672_v10 = vor.u32 %v735_v6, %v669_v7  ;;  %s1008_s17 = smov 126   ;;  %s1009_s3 = smov 120   ;;  %vm322_vm0 = vcmask 990208   ;;  %vm270_vm1 = vcmask 1022976  }
  0x29   : > { %262 = vrot.lane.b32.xlu1 %v660_v5, %s1006_s19  ;;  %v664_v11 = vor.u32 %v733_v8, %v661_v9  ;;  %s1010_s6 = smov 122   ;;  %s1011_s16 = smov 127   ;;  %vm257_vm2 = vcmask 1031168   ;;  %vm335_vm3 = vcmask 982016   ;;  %vm309_vm4 = vcmask 998400  }
  0x2a   : > { %s1012_s21 = smov 123   ;;  %s1013_s22 = smov 124   ;;  %v683_v35 = vld [vmem:[#allocation5 + $0x8] sm:$0xf]  ;;  %v739_v36 = vld [vmem:[#allocation5 + $0x10] sm:$0xf0] }
  0x2b   : > { %v684_v41 = vor.u32 %v739_v36, %v683_v35  ;;  %vm416_vm5 = vcmask 261120   ;;  %vm244_vm6 = vcmask 1039360   ;;  %v695_v47 = vld [vmem:[#allocation5 + $0x20] sm:$0xf]  ;;  %v742_v48 = vld [vmem:[#allocation5 + $0x28] sm:$0xf0] }
  0x2c   : > { %v655_v50 = vld [vmem:[%s1134_s15 + $0x10] sm:$0xf]  ;;  %v732_v51 = vld [vmem:[%s1134_s15 + $0x14] sm:$0xf0]  ;;  %v696_v55 = vor.u32 %v742_v48, %v695_v47  ;;  %v651_v57 = vld [vmem:[%s1134_s15] sm:$0xf] }
  0x2d   : > { %v656_v56 = vor.u32 %v732_v51, %v655_v50  ;;  %v731_v58 = vld [vmem:[%s1134_s15 + $0x4] sm:$0xf0]  ;;  %vm296_vm7 = vcmask 1006592   ;;  %v675_v60 = vld [vmem:[#allocation5] sm:$0xf]  ;;  %vm283_vm8 = vcmask 1014784  }
  0x2e   : > { %v652_v59 = vor.u32 %v731_v58, %v651_v57  ;;  %v738_v61 = vld [vmem:[#allocation5 + $0x8] sm:$0xf0]  ;;  %v687_v0 = vld [vmem:[#allocation5 + $0x18] sm:$0xf]  ;;  %v741_v1 = vld [vmem:[#allocation5 + $0x20] sm:$0xf0] }
  0x2f   : > { %v676_v4 = vor.u32 %v738_v61, %v675_v60  ;;  %v707_v6 = vld [vmem:[#allocation5 + $0x38] sm:$0xf]  ;;  %v745_v7 = vld [vmem:[#allocation5 + $0x40] sm:$0xf0]  ;;  %v746_v35 = vld [vmem:[#allocation5 + $0x4c] sm:$0xf] }
  0x30   : > { %268 = vrot.lane.b32.xlu0 %v672_v10, %s1006_s19  ;;  %320 = vrot.lane.b32.xlu2 %v672_v10, %s1007_s24  ;;  %v713_v36 = vld [vmem:[#allocation5 + $0x54] sm:$0xf0]  ;;  %s648_s23 = sshll.u32 %s1130_s30, 6  ;;  %s749_s18 = sshll.u32 %s991_s12, 6 }
  0x31   : > { %264 = vrot.lane.b32.xlu1 %v664_v11, %s1006_s19  ;;  %s1179_s25 = scalar_lea.vmem [#allocation7], %s648_s23  ;;  %s537_s28 = scalar_lea.hbm %s1230_s2, %s749_s18 }
  0x32   : > { %s538_s5 = sshll.u32 %s1179_s25, 4  ;;  %s540_s7 = sshll.u32 %s537_s28, 4  ;;  %s539_s5 = int_to_ptr.vmem [resolvable:$true] %s538_s5  ;;  %s541_s7 = int_to_ptr.hbm [resolvable:$true] %s540_s7 }
  0x33   : > { %s525_s15 = scalar_lea.sflag [#allocation4], %s1130_s30  ;;  %s927_s19 = sshra.s32 %s541_s7, 4  ;;  %s928_s19 = int_to_ptr.hbm [resolvable:$true] %s927_s19 }
  0x34   : > { %s929_s12 = scalar_lea.hbm %s928_s19, 64  ;;  %p934_p10 = scmp.lt.s32.totalorder %s928_s19, %s1230_s2 }
  0x35   : > { %p930_p1 = scmp.ne.s32.totalorder %s928_s19, %s929_s12 }
  0x37   : > { %p931_p4 = pnand %p930_p1, %p1110_p5 }
  0x38   : > { %253 = vrot.lane.b32.xlu0 %v668_v3, %s1008_s17  ;;  %314 = vrot.lane.b32.xlu2 %v660_v5, %s1007_s24 }
  0x39   : > { %255 = vrot.lane.b32.xlu1 %v672_v10, %s1008_s17  ;;  %p932_p8 = pneg %p931_p4 }
  0x40   : > { %316 = vrot.lane.b32.xlu0 %v664_v11, %s1007_s24  ;;  %333 = vrot.lane.b32.xlu2 %v672_v10, %s1009_s3 }
  0x41   : > { %331 = vrot.lane.b32.xlu1 %v668_v3, %s1009_s3 }
  0x48   : > { %249 = vrot.lane.b32.xlu0 %v660_v5, %s1008_s17  ;;  %305 = vrot.lane.b32.xlu2 %v668_v3, %s1010_s6 }
  0x49   : > { %251 = vrot.lane.b32.xlu1 %v664_v11, %s1008_s17 }
  0x50   : > { %307 = vrot.lane.b32.xlu0 %v672_v10, %s1010_s6  ;;  %329 = vrot.lane.b32.xlu2 %v664_v11, %s1009_s3 }
  0x51   : > { %327 = vrot.lane.b32.xlu1 %v660_v5, %s1009_s3  ;;  %s933_s3 = scalar_lea.hbm %s1230_s2, 128 }
  0x52   : > { %p935_p12 = scmp.lt.s32.totalorder %s933_s3, %s929_s12 }
  0x54   : > { %p936_p13 = por %p935_p12, %p934_p10 }
  0x56   : > { %p937_p0 = pnand %p936_p13, %p932_p8 }
  0x58   : > { %240 = vrot.lane.b32.xlu0 %v668_v3, %s1011_s16  ;;  %301 = vrot.lane.b32.xlu2 %v660_v5, %s1010_s6 }
  0x59   : > { %242 = vrot.lane.b32.xlu1 %v672_v10, %s1011_s16 }
  0x60   : > { %303 = vrot.lane.b32.xlu0 %v664_v11, %s1010_s6  ;;  %238 = vrot.lane.b32.xlu2 %v664_v11, %s1011_s16 }
  0x61   : > { %236 = vrot.lane.b32.xlu1 %v660_v5, %s1011_s16 }
  0x68   : > { %292 = vrot.lane.b32.xlu0 %v668_v3, %s1012_s21  ;;  %288 = vrot.lane.b32.xlu2 %v660_v5, %s1012_s21 }
  0x69   : > { %294 = vrot.lane.b32.xlu1 %v672_v10, %s1012_s21 }
  0x70   : > { %290 = vrot.lane.b32.xlu0 %v664_v11, %s1012_s21  ;;  %281 = vrot.lane.b32.xlu2 %v672_v10, %s1013_s22 }
  0x71   : > { %279 = vrot.lane.b32.xlu1 %v668_v3, %s1013_s22 }
  0x78   : > { %275 = vrot.lane.b32.xlu0 %v660_v5, %s1013_s22  ;;  %v688_v5 = vor.u32 %v741_v1, %v687_v0 }
  0x79   : > { %277 = vrot.lane.b32.xlu1 %v664_v11, %s1013_s22 }
  0x82   : > { %v319_v12 = vpop.permute.xlu2 %318 }
  0x8a   : > { %v321_v13 = vpop.permute.xlu2 %320 }
  0x8b   : > { %v1153_v14 = vsel %vm322_vm0, %v319_v12, %v321_v13  ;;  %v708_v12 = vor.u32 %v745_v7, %v707_v6 }
  0x8c   : > { %758 = vmatpush.bf16.msra.mxu1 %v1153_v14 }
  0x92   : > { %v315_v17 = vpop.permute.xlu2 %314 }
  0x9a   : > { %v267_v15 = vpop.permute.xlu0 %266  ;;  %v334_v22 = vpop.permute.xlu2 %333 }
  0x9b   : > { %v263_v16 = vpop.permute.xlu1 %262 }
  0xa2   : > { %v269_v18 = vpop.permute.xlu0 %268  ;;  %v306_v27 = vpop.permute.xlu2 %305 }
  0xa3   : > { %v265_v19 = vpop.permute.xlu1 %264  ;;  %v272_v20 = vsel %vm270_vm1, %v267_v15, %v269_v18  ;;  %v689_v15 = vld [vmem:[#allocation5 + $0x24] sm:$0xf0]  ;;  %v744_v18 = vld [vmem:[#allocation5 + $0x38] sm:$0xf0] }
  0xa4   : > { %429 = vmatpush.bf16.msra.mxu0 %v272_v20  ;;  %750 = vmatpush.bf16.msra.mxu3 %v272_v20  ;;  %v271_v21 = vsel %vm270_vm1, %v263_v16, %v265_v19 }
  0xa8   : > { %430 = vmatpush.bf16.msra.mxu0 %v271_v21  ;;  %751 = vmatpush.bf16.msra.mxu3 %v271_v21 }
  0xaa   : > { %v254_v23 = vpop.permute.xlu0 %253  ;;  %v330_v34 = vpop.permute.xlu2 %329 }
  0xab   : > { %v256_v24 = vpop.permute.xlu1 %255 }
  0xac   : > { %v259_v25 = vsel %vm257_vm2, %v254_v23, %v256_v24  ;;  %v719_v23 = vld [vmem:[#allocation5 + $0x50] sm:$0xf]  ;;  %v748_v24 = vld [vmem:[#allocation5 + $0x58] sm:$0xf0] }
  0xad   : > { %431 = vmatpush.bf16.msra.mxu0 %v259_v25  ;;  %752 = vmatpush.bf16.msra.mxu3 %v259_v25  ;;  %v720_v25 = vor.u32 %v748_v24, %v719_v23 }
  0xb2   : > { %v317_v26 = vpop.permute.xlu0 %316  ;;  %v302_v42 = vpop.permute.xlu2 %301 }
  0xb3   : > { %v332_v28 = vpop.permute.xlu1 %331  ;;  %v1158_v29 = vsel %vm322_vm0, %v315_v17, %v317_v26  ;;  %v699_v17 = vld [vmem:[#allocation5 + $0x30] sm:$0xf]  ;;  %v737_v26 = vld [vmem:[#allocation5 + $0x4] sm:$0xf] }
  0xb4   : > { %759 = vmatpush.bf16.msra.mxu1 %v1158_v29  ;;  %v337_v30 = vsel %vm335_vm3, %v332_v28, %v334_v22  ;;  %v700_v22 = vor.u32 %v744_v18, %v699_v17 }
  0xb5   : > { %493 = vmatpush.bf16.msra.mxu2 %v337_v30  ;;  %v701_v30 = vld [vmem:[#allocation5 + $0x3c] sm:$0xf0] }
  0xba   : > { %v250_v31 = vpop.permute.xlu0 %249  ;;  %v239_v46 = vpop.permute.xlu2 %238 }
  0xbb   : > { %v252_v32 = vpop.permute.xlu1 %251 }
  0xbc   : > { %v258_v33 = vsel %vm257_vm2, %v250_v31, %v252_v32  ;;  %v711_v31 = vld [vmem:[#allocation5 + $0x48] sm:$0xf]  ;;  %v747_v32 = vld [vmem:[#allocation5 + $0x50] sm:$0xf0] }
  0xbd   : > { %432 = vmatpush.bf16.msra.mxu0 %v258_v33  ;;  %753 = vmatpush.bf16.msra.mxu3 %v258_v33 }
  0xc2   : > { %v308_v37 = vpop.permute.xlu0 %307  ;;  %v289_v62 = vpop.permute.xlu2 %288 }
  0xc3   : > { %v328_v38 = vpop.permute.xlu1 %327  ;;  %v311_v39 = vsel %vm309_vm4, %v306_v27, %v308_v37  ;;  %v677_v27 = vld [vmem:[#allocation5 + $0xc] sm:$0xf0]  ;;  %v716_v37 = vor.u32 %v746_v35, %v713_v36 }
  0xc4   : > { %760 = vmatpush.bf16.msra.mxu1 %v311_v39  ;;  %v336_v40 = vsel %vm335_vm3, %v328_v38, %v330_v34  ;;  %v680_v28 = vor.u32 %v737_v26, %v677_v27  ;;  %v712_v34 = vor.u32 %v747_v32, %v711_v31 }
  0xc5   : > { %494 = vmatpush.bf16.msra.mxu2 %v336_v40 }
  0xc8   : > { %721 = vmatmul.msk.bf16.vlgmr.msra.gmra.mxu2 %vm416_vm5, %v684_v41 }
  0xca   : > { %v241_v43 = vpop.permute.xlu0 %240  ;;  %v282_v11 = vpop.permute.xlu2 %281 }
  0xcb   : > { %v243_v44 = vpop.permute.xlu1 %242 }
  0xcc   : > { %v246_v45 = vsel %vm244_vm6, %v241_v43, %v243_v44 }
  0xcd   : > { %433 = vmatpush.bf16.msra.mxu0 %v246_v45  ;;  %754 = vmatpush.bf16.msra.mxu3 %v246_v45 }
  0xd2   : > { %v304_v49 = vpop.permute.xlu0 %303 }
  0xd3   : > { %v237_v52 = vpop.permute.xlu1 %236  ;;  %v310_v53 = vsel %vm309_vm4, %v302_v42, %v304_v49 }
  0xd4   : > { %v245_v54 = vsel %vm244_vm6, %v237_v52, %v239_v46  ;;  %761 = vmatpush.bf16.msra.mxu1 %v310_v53 }
  0xd5   : > { %434 = vmatpush.bf16.msra.mxu0 %v245_v54  ;;  %755 = vmatpush.bf16.msra.mxu3 %v245_v54 }
  0xd8   : > { %722 = vmatmul.msk.bf16.gmra.mxu2 %vm416_vm5, %v696_v55 }
  0xd9   : > { %435 = vmatpush.bf16.msra.mxu0 %v656_v56  ;;  %756 = vmatpush.bf16.msra.mxu3 %v656_v56 }
  0xda   : > { %v293_v63 = vpop.permute.xlu0 %292 }
  0xdb   : > { %v295_v2 = vpop.permute.xlu1 %294 }
  0xdc   : > { %v298_v3 = vsel %vm296_vm7, %v293_v63, %v295_v2 }
  0xdd   : > { %436 = vmatpush.bf16.msra.mxu0 %v652_v59  ;;  %762 = vmatpush.bf16.msra.mxu1 %v298_v3 }
  0xde   : > { %757 = vmatpush.bf16.msra.mxu3 %v652_v59 }
  0xe0   : > { %437 = vmatmul.bf16.vlgmr.msra.gmra.mxu0 %v676_v4 }
  0xe1   : > { %458 = vmatpush.bf16.msrb.mxu0 %v1153_v14  ;;  %442 = vmatmul.bf16.vlgmr.msra.gmra.mxu3 %v688_v5  ;;  %v740_v14 = vld [vmem:[#allocation5 + $0x1c] sm:$0xf] }
  0xe2   : > { %v291_v8 = vpop.permute.xlu0 %290  ;;  %v692_v21 = vor.u32 %v740_v14, %v689_v15 }
  0xe3   : > { %v280_v9 = vpop.permute.xlu1 %279  ;;  %v297_v10 = vsel %vm296_vm7, %v289_v62, %v291_v8 }
  0xe4   : > { %763 = vmatpush.bf16.msra.mxu1 %v297_v10  ;;  %v285_v13 = vsel %vm283_vm8, %v280_v9, %v282_v11 }
  0xe5   : > { %459 = vmatpush.bf16.msrb.mxu0 %v1158_v29  ;;  %v743_v29 = vld [vmem:[#allocation5 + $0x34] sm:$0xf] }
  0xe6   : > { %v704_v33 = vor.u32 %v743_v29, %v701_v30 }
  0xe8   : > { %764 = vmatpush.bf16.msra.mxu1 %v285_v13  ;;  %723 = vmatmul.msk.bf16.gmra.mxu2 %vm416_vm5, %v708_v12 }
  0xe9   : > { %460 = vmatpush.bf16.msrb.mxu0 %v311_v39 }
  0xea   : > { %v276_v16 = vpop.permute.xlu0 %275 }
  0xeb   : > { %v278_v19 = vpop.permute.xlu1 %277 }
  0xec   : > { %v284_v20 = vsel %vm283_vm8, %v276_v16, %v278_v19 }
  0xed   : > { %461 = vmatpush.bf16.msrb.mxu0 %v310_v53  ;;  %765 = vmatpush.bf16.msra.mxu1 %v284_v20 }
  0xf0   : > { %471 = vmatmul.bf16.vlgmr.msra.gmra.mxu1 %v692_v21 }
  0xf1   : > { %462 = vmatpush.bf16.msrb.mxu0 %v298_v3  ;;  %447 = vmatmul.bf16.gmra.mxu3 %v700_v22 }
  0xf5   : > { %463 = vmatpush.bf16.msrb.mxu0 %v297_v10 }
  0xf8   : > { %724 = vmatmul.msk.bf16.gmra.mxu2 %vm416_vm5, %v720_v25 }
  0xf9   : > { %464 = vmatpush.bf16.msrb.mxu0 %v285_v13 }
  0xfd   : > { %465 = vmatpush.bf16.msrb.mxu0 %v284_v20 }
 0x100   : > { %466 = vmatmul.bf16.vlgmr.msrb.gmra.mxu0 %v680_v28  ;;  %476 = vmatmul.bf16.gmra.mxu1 %v704_v33 }
 0x101   : > { %452 = vmatmul.bf16.gmra.mxu3 %v712_v34 }
 0x110   : > { %481 = vmatmul.bf16.gmra.mxu1 %v716_v37 }
 0x14b   : > { %v496_v38 = vpop.f32.mrf.mxu2 }
 0x153   : > { %v498_v39 = vpop.f32.mrf.mxu2 }
 0x15b   : > { %v501_v41 = vpop.f32.mrf.mxu2 }
 0x15d   : > { %v438_v42 = vpop.f32.mrf.mxu0 }
 0x163   : > { %v503_v46 = vpop.f32.mrf.mxu2 }
 0x164   : > { %v443_v40 = vpop.f32.mrf.mxu3 }
 0x165   : > { %v440_v48 = vpop.f32.mrf.mxu0 }
 0x16b   : > { %v506_v53 = vpop.f32.mrf.mxu2 }
 0x16c   : > { %v445_v43 = vpop.f32.mrf.mxu3 }
 0x16d   : > { %v472_v44 = vpop.f32.mrf.mxu1 }
 0x16e   : > { %v473_v45 = vadd.f32 %v472_v44, %v443_v40 }
 0x170   : > { %v502_v47 = vadd.f32 %v501_v41, %v473_v45 }
 0x172   : > { %518 = vst [vmem:[%s1179_s25 + $0x10] sm:$0xff] %v502_v47 }
 0x173   : > { %v508_v62 = vpop.f32.mrf.mxu2 }
 0x174   : > { %v448_v51 = vpop.f32.mrf.mxu3 }
 0x175   : > { %v474_v49 = vpop.f32.mrf.mxu1 }
 0x176   : > { %v475_v50 = vadd.f32 %v474_v49, %v445_v43 }
 0x178   : > { %v504_v52 = vadd.f32 %v503_v46, %v475_v50 }
 0x17a   : > { %519 = vst [vmem:[%s1179_s25 + $0x18] sm:$0xff] %v504_v52 }
 0x17b   : > { %v511_v5 = vpop.f32.mrf.mxu2 }
 0x17c   : > { %v450_v60 = vpop.f32.mrf.mxu3 }
 0x17d   : > { %v467_v54 = vpop.f32.mrf.mxu0  ;;  %v477_v57 = vpop.f32.mrf.mxu1 }
 0x17e   : > { %v468_v55 = vadd.f32 %v467_v54, %v438_v42  ;;  %v478_v58 = vadd.f32 %v477_v57, %v448_v51 }
 0x180   : > { %v497_v56 = vadd.f32 %v496_v38, %v468_v55  ;;  %v507_v59 = vadd.f32 %v506_v53, %v478_v58 }
 0x182   : > { %516 = vst [vmem:[%s1179_s25] sm:$0xff] %v497_v56 }
 0x183   : > { %520 = vst [vmem:[%s1179_s25 + $0x20] sm:$0xff] %v507_v59  ;;  %v513_v12 = vpop.f32.mrf.mxu2 }
 0x184   : > { %v453_v4 = vpop.f32.mrf.mxu3 }
 0x185   : > { %v469_v61 = vpop.f32.mrf.mxu0  ;;  %v479_v1 = vpop.f32.mrf.mxu1 }
 0x186   : > { %v470_v63 = vadd.f32 %v469_v61, %v440_v48  ;;  %v480_v2 = vadd.f32 %v479_v1, %v450_v60 }
 0x188   : > { %v499_v0 = vadd.f32 %v498_v39, %v470_v63  ;;  %v509_v3 = vadd.f32 %v508_v62, %v480_v2 }
 0x18a   : > { %517 = vst [vmem:[%s1179_s25 + $0x8] sm:$0xff] %v499_v0 }
 0x18b   : > { %521 = vst [vmem:[%s1179_s25 + $0x28] sm:$0xff] %v509_v3 }
 0x18c   : > { %v455_v9 = vpop.f32.mrf.mxu3 }
 0x18d   : > { %v482_v6 = vpop.f32.mrf.mxu1 }
 0x18e   : > { %v483_v7 = vadd.f32 %v482_v6, %v453_v4 }
 0x190   : > { %v512_v8 = vadd.f32 %v511_v5, %v483_v7 }
 0x192   : > { %522 = vst [vmem:[%s1179_s25 + $0x30] sm:$0xff] %v512_v8 }
 0x195   : > { %v484_v10 = vpop.f32.mrf.mxu1 }
 0x196   : > { %v485_v11 = vadd.f32 %v484_v10, %v455_v9 }
 0x198   : > { %v514_v13 = vadd.f32 %v513_v12, %v485_v11 }
 0x19a   : > { %523 = vst [vmem:[%s1179_s25 + $0x38] sm:$0xff] %v514_v13 }
 0x19b   : > { %940 = shalt.err (!%p937_p0)
}
 0x19c   : > { %s1014_s30 = smov 128   ;;  %s1015_s21 = smov 8  }
 0x19d   : > { %772 = dma.vmem_to_hbm [thread:$0]  (%p1110_p5), %s539_s5, 1024, %s541_s7, %s525_s15, %s1014_s30, %s1014_s30, %s1015_s21  }
 0x19e PF: > { %s555_s22 = sand.u32 1, %s979_s9   ;;  %p783_p3 = pnand %p641_p11, %p1080_p6 }
 0x19f   : > { %s556_s23 = scalar_lea.sflag [#allocation4], %s555_s22 }
 0x1a0   : > { %p784_p7 = pneg %p783_p3 }
 0x1a2   : > { %974 = dma.done.wait (%p784_p7), %s556_s23, 1024  }
 0x1a3   : > { %976 = vsyncadd (%p784_p7), %s556_s23, 4294966272  ;;  %s19_s14 = sadd.s32 1, %s999_s14   ;;  %s1238_s9 = smov %s983_s10 }
 0x1a4   : > { %p16_p9 = scmp.ge.s32.totalorder %s19_s14, 4   ;;  %s1239_s10 = smov %s987_s11 }
 0x1a5   : > { %s1240_s11 = smov %s1119_s8  ;;  %s1241_s12 = smov %s995_s13 }
 0x1a6   : > { %s1242_s13 = smov %s1244_s29  ;;  %18 = sbr.rel (!%p16_p9) target bundleno = 7 (0x7), region = 77 }
 0x1ab   :  { %562 = vsyncpa [#allocation3], 1 }
 0x1ac   :  { %564 = vsyncpa [#allocation3 + $0x1], 1 }
 0x1ad   :  { %565 = vsyncpa [#allocation6], 1 }
 0x1ae   :  { %566 = vsyncpa [#allocation4], 1 }
 0x1af   :  { %568 = vsyncpa [#allocation4 + $0x1], 1 }

</bundles_post_ra>
